<compile_context>
chip_gen: v7x
topology: tpu7x:2x2x1
jax: 0.10.0
libtpu: 0.0.40
codegen_flags: <defaults>
</compile_context>

<pallas_src>
import jax
import jax.numpy as jnp
from jax.experimental import pallas as pl
from jax.experimental.pallas import tpu as pltpu


# ----------------------------------------------------------------------------
# Pallas kernel: fused fwd+bwd recurrence, grid = (direction, time block)
# ----------------------------------------------------------------------------
def _bilstm_rec_kernel(gx_ref, whhT_ref, h0_ref, c0_ref, out_ref, h_scr, c_scr):
    """One (direction, time-block) grid step of the fused bidirectional LSTM.

    gx_ref   : (1, TB, B, 4H)  precomputed x-projection + bias (f32)
    whhT_ref : (1, H, 4H)      recurrent weights W_hh^T (compute dtype)
    h0_ref   : (1, B, H)       initial hidden state for this direction
    c0_ref   : (1, B, H)       initial cell state for this direction
    out_ref  : (1, TB, B, H)   hidden states for this block (natural time order)
    h_scr/c_scr : (B, H) f32   carries across time blocks of one direction
    """
    d = pl.program_id(0)          # 0 = forward, 1 = backward
    j = pl.program_id(1)          # time-block index within this direction
    TB = out_ref.shape[1]
    H = h_scr.shape[-1]

    @pl.when(j == 0)
    def _():  # (re)initialize the carries at the start of each direction
        h_scr[...] = h0_ref[0].astype(jnp.float32)
        c_scr[...] = c0_ref[0].astype(jnp.float32)

    whhT = whhT_ref[0]            # (H, 4H); hoisted out of the unrolled loop

    def step(s, carry):
        h, c = carry
        # Local time index: forward walks 0..TB-1, backward walks TB-1..0.
        lt = s + d * (TB - 1 - 2 * s)
        gates = gx_ref[0, lt] + jnp.dot(h.astype(whhT.dtype), whhT,
                                        preferred_element_type=jnp.float32)  # (B,4H) f32
        # One wide sigmoid over the whole gate slab (single EUP pass), tanh on g.
        # TODO(synk): with H a multiple of 128 these slices become free vreg
        # selects; at H=32 they are sub-lane extracts (accepted at this size).
        sig = jax.nn.sigmoid(gates)
        i = sig[:, 0 * H:1 * H]
        f = sig[:, 1 * H:2 * H]
        o = sig[:, 3 * H:4 * H]
        g = jnp.tanh(gates[:, 2 * H:3 * H])
        c_new = f * c + i * g
        h_new = o * jnp.tanh(c_new)
        out_ref[0, lt] = h_new.astype(out_ref.dtype)
        return h_new, c_new

    h, c = jax.lax.fori_loop(0, TB, step, (h_scr[...], c_scr[...]), unroll=True)
    h_scr[...] = h
    c_scr[...] = c


def _bilstm_recurrence(gates_x, whhT, h0, c0, *, out_dtype, time_block):
    """Fused fwd+bwd LSTM recurrence over precomputed input projections.

    gates_x : (2, S, B, 4H) f32   x @ W_ih^T + (b_ih + b_hh), both directions
    whhT    : (2, H, 4H)          recurrent weights, transposed
    h0, c0  : (2, B, H)           initial states (index 0 = fwd, 1 = bwd)
    returns : (2, S, B, H)        per-direction hidden states, natural time order
    """
    _, S, B, G = gates_x.shape
    H = whhT.shape[-2]
    TB = time_block
    nTB = S // TB
    assert nTB * TB == S

    # Time-block index: forward uses block j, backward walks blocks from the end.
    def t_block(d, j):
        return j + d * (nTB - 1 - 2 * j)      # d=0 -> j ; d=1 -> nTB-1-j

    return pl.pallas_call(
        _bilstm_rec_kernel,
        out_shape=jax.ShapeDtypeStruct((2, S, B, H), out_dtype),
        grid_spec=pltpu.PrefetchScalarGridSpec(
            num_scalar_prefetch=0,
            grid=(2, nTB),                                    # (direction, time blocks)
            in_specs=[
                pl.BlockSpec((1, TB, B, G), lambda d, j: (d, t_block(d, j), 0, 0)),
                # Resident operands (constant index_map along time): weights and
                # initial states.  For large H on v7x these should be
                # single-buffered (pipeline_mode=pl.Buffered(1)) to avoid dead
                # VMEM duplication; negligible at this size.
                pl.BlockSpec((1, H, G), lambda d, j: (d, 0, 0)),
                pl.BlockSpec((1, B, H), lambda d, j: (d, 0, 0)),
                pl.BlockSpec((1, B, H), lambda d, j: (d, 0, 0)),
            ],
            out_specs=pl.BlockSpec((1, TB, B, H), lambda d, j: (d, t_block(d, j), 0, 0)),
            scratch_shapes=[
                pltpu.VMEM((B, H), jnp.float32),   # h carry
                pltpu.VMEM((B, H), jnp.float32),   # c carry
            ],
        ),
        compiler_params=pltpu.CompilerParams(
            # direction axis is embarrassingly parallel (2 TCs on v7x);
            # time is a sequential recurrence.
            dimension_semantics=("parallel", "arbitrary"),
            # Explicit scoped-VMEM budget, safe on v5e/v6e (128 MiB physical)
            # and v7x (64 MiB).  Raise toward 128 MiB on v5e/v6e for large H/TB.
            vmem_limit_bytes=48 * 1024 * 1024,
        ),
    )(gates_x, whhT, h0, c0)


# ----------------------------------------------------------------------------
# BiLSTM module: parameter init + forward (matches PyTorch LSTM semantics)
# ----------------------------------------------------------------------------
def init_bilstm_params(key, input_features, recurrent_features, num_layers=1):
    """PyTorch-style init: U(-1/sqrt(H), 1/sqrt(H)), gate order i,f,g,o."""
    H = recurrent_features
    k = 1.0 / jnp.sqrt(jnp.float32(H))
    params = []
    for layer in range(num_layers):
        in_f = input_features if layer == 0 else 2 * H
        layer_p = {}
        for direction in ("fwd", "bwd"):
            key, k1, k2, k3, k4 = jax.random.split(key, 5)
            layer_p[direction] = dict(
                w_ih=jax.random.uniform(k1, (4 * H, in_f), jnp.float32, -k, k),
                w_hh=jax.random.uniform(k2, (4 * H, H), jnp.float32, -k, k),
                b_ih=jax.random.uniform(k3, (4 * H,), jnp.float32, -k, k),
                b_hh=jax.random.uniform(k4, (4 * H,), jnp.float32, -k, k),
            )
        params.append(layer_p)
    return params


def _pick_time_block(S, target):
    tb = min(S, target)
    while S % tb != 0:
        tb -= 1
    return max(tb, 1)


def bilstm_forward(x, params, hc=None, *, compute_dtype=jnp.bfloat16,
                   time_block_target=16):
    """x: (batch, seq, input_features) -> (batch, seq, 2*hidden).

    Matches torch.nn.LSTM(batch_first=True, bidirectional=True) run on the full
    sequence (== the module's training path, and its eval path whenever
    seq_len <= inference_chunk_length).
    """
    B, S, _ = x.shape
    H = params[0]["fwd"]["w_hh"].shape[1]
    L = len(params)

    if hc is None:
        h0 = jnp.zeros((2 * L, B, H), jnp.float32)
        c0 = jnp.zeros((2 * L, B, H), jnp.float32)
    else:
        h0, c0 = hc

    TB = _pick_time_block(S, time_block_target)

    layer_in = jnp.transpose(x, (1, 0, 2))          # time-major (S, B, F)
    for layer in range(L):
        pf, pb = params[layer]["fwd"], params[layer]["bwd"]

        # Hoisted input projection: one big matmul per direction (M = S*B),
        # bias folded in.  gates_x kept f32 (feeds the sensitive recurrence);
        # the matmul runs in compute_dtype with f32 accumulation.
        gx = []
        for p in (pf, pb):
            wihT = jnp.transpose(p["w_ih"]).astype(compute_dtype)      # (F, 4H)
            bias = (p["b_ih"] + p["b_hh"]).astype(jnp.float32)         # (4H,)
            gx.append(jnp.einsum("sbf,fg->sbg", layer_in.astype(compute_dtype),
                                 wihT, preferred_element_type=jnp.float32) + bias)
        gates_x = jnp.stack(gx, axis=0)                                # (2, S, B, 4H)

        whhT = jnp.stack([jnp.transpose(pf["w_hh"]),
                          jnp.transpose(pb["w_hh"])], axis=0).astype(compute_dtype)

        out = _bilstm_recurrence(
            gates_x, whhT,
            h0[2 * layer:2 * layer + 2].astype(jnp.float32),
            c0[2 * layer:2 * layer + 2].astype(jnp.float32),
            out_dtype=x.dtype, time_block=TB)                          # (2, S, B, H)

        layer_in = jnp.concatenate([out[0], out[1]], axis=-1)          # (S, B, 2H)
        # TODO(synk): inter-layer dropout (training mode only) is not applied.

    # TODO(synk): the module's chunked eval path (inference_chunk_length) is a
    # memory-saving approximation; this computes the exact full-sequence BiLSTM
    # (identical when seq_len <= inference_chunk_length).
    return jnp.transpose(layer_in, (1, 0, 2))                          # (B, S, 2H)


# ----------------------------------------------------------------------------
# Pure-JAX reference (lax.scan) for correctness checking
# ----------------------------------------------------------------------------
def _ref_direction(x_tm, p, h0, c0, reverse):
    def step(carry, xt):
        h, c = carry
        gates = xt @ p["w_ih"].T + p["b_ih"] + h @ p["w_hh"].T + p["b_hh"]
        i, f, g, o = jnp.split(gates, 4, axis=-1)
        i, f, o = jax.nn.sigmoid(i), jax.nn.sigmoid(f), jax.nn.sigmoid(o)
        g = jnp.tanh(g)
        c = f * c + i * g
        h = o * jnp.tanh(c)
        return (h, c), h

    xs = x_tm[::-1] if reverse else x_tm
    _, hs = jax.lax.scan(step, (h0, c0), xs)
    return hs[::-1] if reverse else hs


def bilstm_ref(x, params, hc=None):
    B, S, _ = x.shape
    H = params[0]["fwd"]["w_hh"].shape[1]
    L = len(params)
    if hc is None:
        h0 = jnp.zeros((2 * L, B, H), x.dtype)
        c0 = jnp.zeros((2 * L, B, H), x.dtype)
    else:
        h0, c0 = hc
    layer_in = jnp.transpose(x, (1, 0, 2))
    for layer in range(L):
        f = _ref_direction(layer_in, params[layer]["fwd"], h0[2 * layer], c0[2 * layer], False)
        b = _ref_direction(layer_in, params[layer]["bwd"], h0[2 * layer + 1], c0[2 * layer + 1], True)
        layer_in = jnp.concatenate([f, b], axis=-1)
    return jnp.transpose(layer_in, (1, 0, 2))


# ----------------------------------------------------------------------------
if __name__ == "__main__":
    batch, seq_len = 2, 8
    input_features, recurrent_features = 16, 32
    num_layers = 2

    key = jax.random.PRNGKey(0)
    kx, kp, kh, kc = jax.random.split(key, 4)
    x = jax.random.normal(kx, (batch, seq_len, input_features), jnp.float32)
    params = init_bilstm_params(kp, input_features, recurrent_features, num_layers)
    h0 = 0.1 * jax.random.normal(kh, (2 * num_layers, batch, recurrent_features), jnp.float32)
    c0 = 0.1 * jax.random.normal(kc, (2 * num_layers, batch, recurrent_features), jnp.float32)

    ref = jax.block_until_ready(bilstm_ref(x, params, (h0, c0)))

    # Exactness check: f32 compute path against the lax.scan reference.
    out_f32 = jax.block_until_ready(
        bilstm_forward(x, params, (h0, c0), compute_dtype=jnp.float32))
    assert out_f32.shape == (batch, seq_len, 2 * recurrent_features), out_f32.shape
    assert jnp.allclose(out_f32, ref, atol=1e-4, rtol=1e-4), \
        float(jnp.max(jnp.abs(out_f32 - ref)))

    # Performance path: bf16 weights/activations on the MXU, f32 accumulation
    # and f32 h/c carries.  Tolerance loosened accordingly (bf16 mantissa).
    out_bf16 = jax.block_until_ready(
        bilstm_forward(x, params, (h0, c0), compute_dtype=jnp.bfloat16))
    assert out_bf16.shape == (batch, seq_len, 2 * recurrent_features), out_bf16.shape
    assert jnp.allclose(out_bf16, ref, atol=3e-2, rtol=3e-2), \
        float(jnp.max(jnp.abs(out_bf16 - ref)))

    print("KERNEL_OK")
</pallas_src>

<mosaic_0001>
module attributes {stable_mosaic.version = 11 : i64} {
  func.func @_bilstm_rec_kernel(%arg0: i32, %arg1: i32, %arg2: memref<1x8x2x128xf32, #tpu.memory_space<vmem>>, %arg3: memref<1x32x128xf32, #tpu.memory_space<vmem>>, %arg4: memref<1x2x32xf32, #tpu.memory_space<vmem>>, %arg5: memref<1x2x32xf32, #tpu.memory_space<vmem>>, %arg6: memref<1x8x2x32xf32, #tpu.memory_space<vmem>>, %arg7: memref<2x32xf32, #tpu.memory_space<vmem>>, %arg8: memref<2x32xf32, #tpu.memory_space<vmem>>) attributes {dimension_semantics = [#tpu.dimension_semantics<parallel>, #tpu.dimension_semantics<arbitrary>], iteration_bounds = array<i64: 2, 1>, scalar_prefetch = 0 : i64, scratch_operands = 2 : i64, tpu.core_type = #tpu.core_type<tc>, window_params = [{transform_indices = @transform_0, window_bounds = array<i64: 1, 8, 2, 128>}, {transform_indices = @transform_1, window_bounds = array<i64: 1, 32, 128>}, {transform_indices = @transform_2, window_bounds = array<i64: 1, 2, 32>}, {transform_indices = @transform_3, window_bounds = array<i64: 1, 2, 32>}, {transform_indices = @transform_4, window_bounds = array<i64: 1, 8, 2, 32>}]} {
    %c0_i32 = arith.constant 0 : i32
    %0 = arith.cmpi eq, %arg1, %c0_i32 : i32
    %1 = arith.extui %0 : i1 to i32
    %c0_i32_0 = arith.constant 0 : i32
    %2 = arith.cmpi ne, %1, %c0_i32_0 : i32
    scf.if %2 {
      %c0_91 = arith.constant 0 : index
      %c0_92 = arith.constant 0 : index
      %c0_93 = arith.constant 0 : index
      %233 = vector.load %arg4[%c0_91, %c0_92, %c0_93] : memref<1x2x32xf32, #tpu.memory_space<vmem>>, vector<1x2x32xf32>
      %234 = vector.shape_cast %233 : vector<1x2x32xf32> to vector<2x32xf32>
      %c0_94 = arith.constant 0 : index
      %c0_95 = arith.constant 0 : index
      %235 = vector.load %arg7[%c0_94, %c0_95] : memref<2x32xf32, #tpu.memory_space<vmem>>, vector<2x32xf32>
      tpu.vector_store %arg7[%c0_94, %c0_95], %234 {strides = array<i32>} : memref<2x32xf32, #tpu.memory_space<vmem>>, vector<2x32xf32>,
      %c0_96 = arith.constant 0 : index
      %c0_97 = arith.constant 0 : index
      %c0_98 = arith.constant 0 : index
      %236 = vector.load %arg5[%c0_96, %c0_97, %c0_98] : memref<1x2x32xf32, #tpu.memory_space<vmem>>, vector<1x2x32xf32>
      %237 = vector.shape_cast %236 : vector<1x2x32xf32> to vector<2x32xf32>
      %c0_99 = arith.constant 0 : index
      %c0_100 = arith.constant 0 : index
      %238 = vector.load %arg8[%c0_99, %c0_100] : memref<2x32xf32, #tpu.memory_space<vmem>>, vector<2x32xf32>
      tpu.vector_store %arg8[%c0_99, %c0_100], %237 {strides = array<i32>} : memref<2x32xf32, #tpu.memory_space<vmem>>, vector<2x32xf32>,
    } else {
    }
    %c0 = arith.constant 0 : index
    %c0_1 = arith.constant 0 : index
    %c0_2 = arith.constant 0 : index
    %3 = vector.load %arg3[%c0, %c0_1, %c0_2] : memref<1x32x128xf32, #tpu.memory_space<vmem>>, vector<1x32x128xf32>
    %4 = vector.shape_cast %3 : vector<1x32x128xf32> to vector<32x128xf32>
    %c0_3 = arith.constant 0 : index
    %c0_4 = arith.constant 0 : index
    %5 = vector.load %arg7[%c0_3, %c0_4] : memref<2x32xf32, #tpu.memory_space<vmem>>, vector<2x32xf32>
    %c0_5 = arith.constant 0 : index
    %c0_6 = arith.constant 0 : index
    %6 = vector.load %arg8[%c0_5, %c0_6] : memref<2x32xf32, #tpu.memory_space<vmem>>, vector<2x32xf32>
    %c0_i32_7 = arith.constant 0 : i32
    %c2_i32 = arith.constant 2 : i32
    %7 = arith.muli %c2_i32, %c0_i32_7 : i32
    %c7_i32 = arith.constant 7 : i32
    %8 = arith.subi %c7_i32, %7 : i32
    %9 = arith.muli %arg0, %8 : i32
    %10 = arith.addi %c0_i32_7, %9 : i32
    %c0_8 = arith.constant 0 : index
    %11 = arith.index_cast %10 : i32 to index
    %c0_9 = arith.constant 0 : index
    %c0_10 = arith.constant 0 : index
    %12 = vector.load %arg2[%c0_8, %11, %c0_9, %c0_10] : memref<1x8x2x128xf32, #tpu.memory_space<vmem>>, vector<1x1x2x128xf32>
    %13 = vector.shape_cast %12 : vector<1x1x2x128xf32> to vector<2x128xf32>
    %cst = arith.constant dense<0.000000e+00> : vector<2x128xf32>
    %14 = tpu.matmul %5, %4, %cst {dimension_numbers = #tpu.dot_dimension_numbers<[1], [0], [0], [1], [0, 0, 1, 1], [], []>} : vector<2x32xf32>, vector<32x128xf32>, vector<2x128xf32> -> vector<2x128xf32>
    %15 = arith.addf %13, %14 : vector<2x128xf32>
    %16 = arith.negf %15 : vector<2x128xf32>
    %17 = math.exp %16 : vector<2x128xf32>
    %cst_11 = arith.constant 1.000000e+00 : f32
    %18 = vector.broadcast %cst_11 : f32 to vector<2x128xf32>
    %19 = arith.addf %18, %17 : vector<2x128xf32>
    %20 = arith.divf %18, %19 : vector<2x128xf32>
    %21 = vector.extract_strided_slice %20 {offsets = [0, 0], sizes = [2, 32], strides = [1, 1]} : vector<2x128xf32> to vector<2x32xf32>
    %22 = vector.extract_strided_slice %20 {offsets = [0, 32], sizes = [2, 32], strides = [1, 1]} : vector<2x128xf32> to vector<2x32xf32>
    %23 = vector.extract_strided_slice %20 {offsets = [0, 96], sizes = [2, 32], strides = [1, 1]} : vector<2x128xf32> to vector<2x32xf32>
    %24 = vector.extract_strided_slice %15 {offsets = [0, 64], sizes = [2, 32], strides = [1, 1]} : vector<2x128xf32> to vector<2x32xf32>
    %25 = math.tanh %24 : vector<2x32xf32>
    %26 = arith.mulf %22, %6 : vector<2x32xf32>
    %27 = arith.mulf %21, %25 : vector<2x32xf32>
    %28 = arith.addf %26, %27 : vector<2x32xf32>
    %29 = math.tanh %28 : vector<2x32xf32>
    %30 = arith.mulf %23, %29 : vector<2x32xf32>
    %c0_12 = arith.constant 0 : index
    %31 = arith.index_cast %10 : i32 to index
    %c0_13 = arith.constant 0 : index
    %c0_14 = arith.constant 0 : index
    %32 = vector.load %arg6[%c0_12, %31, %c0_13, %c0_14] : memref<1x8x2x32xf32, #tpu.memory_space<vmem>>, vector<1x1x2x32xf32>
    %33 = vector.shape_cast %32 : vector<1x1x2x32xf32> to vector<2x32xf32>
    %34 = vector.shape_cast %30 : vector<2x32xf32> to vector<1x1x2x32xf32>
    tpu.vector_store %arg6[%c0_12, %31, %c0_13, %c0_14], %34 {strides = array<i32>} : memref<1x8x2x32xf32, #tpu.memory_space<vmem>>, vector<1x1x2x32xf32>,
    %c1_i32 = arith.constant 1 : i32
    %c2_i32_15 = arith.constant 2 : i32
    %35 = arith.muli %c2_i32_15, %c1_i32 : i32
    %c7_i32_16 = arith.constant 7 : i32
    %36 = arith.subi %c7_i32_16, %35 : i32
    %37 = arith.muli %arg0, %36 : i32
    %38 = arith.addi %c1_i32, %37 : i32
    %c0_17 = arith.constant 0 : index
    %39 = arith.index_cast %38 : i32 to index
    %c0_18 = arith.constant 0 : index
    %c0_19 = arith.constant 0 : index
    %40 = vector.load %arg2[%c0_17, %39, %c0_18, %c0_19] : memref<1x8x2x128xf32, #tpu.memory_space<vmem>>, vector<1x1x2x128xf32>
    %41 = vector.shape_cast %40 : vector<1x1x2x128xf32> to vector<2x128xf32>
    %cst_20 = arith.constant dense<0.000000e+00> : vector<2x128xf32>
    %42 = tpu.matmul %30, %4, %cst_20 {dimension_numbers = #tpu.dot_dimension_numbers<[1], [0], [0], [1], [0, 0, 1, 1], [], []>} : vector<2x32xf32>, vector<32x128xf32>, vector<2x128xf32> -> vector<2x128xf32>
    %43 = arith.addf %41, %42 : vector<2x128xf32>
    %44 = arith.negf %43 : vector<2x128xf32>
    %45 = math.exp %44 : vector<2x128xf32>
    %cst_21 = arith.constant 1.000000e+00 : f32
    %46 = vector.broadcast %cst_21 : f32 to vector<2x128xf32>
    %47 = arith.addf %46, %45 : vector<2x128xf32>
    %48 = arith.divf %46, %47 : vector<2x128xf32>
    %49 = vector.extract_strided_slice %48 {offsets = [0, 0], sizes = [2, 32], strides = [1, 1]} : vector<2x128xf32> to vector<2x32xf32>
    %50 = vector.extract_strided_slice %48 {offsets = [0, 32], sizes = [2, 32], strides = [1, 1]} : vector<2x128xf32> to vector<2x32xf32>
    %51 = vector.extract_strided_slice %48 {offsets = [0, 96], sizes = [2, 32], strides = [1, 1]} : vector<2x128xf32> to vector<2x32xf32>
    %52 = vector.extract_strided_slice %43 {offsets = [0, 64], sizes = [2, 32], strides = [1, 1]} : vector<2x128xf32> to vector<2x32xf32>
    %53 = math.tanh %52 : vector<2x32xf32>
    %54 = arith.mulf %50, %28 : vector<2x32xf32>
    %55 = arith.mulf %49, %53 : vector<2x32xf32>
    %56 = arith.addf %54, %55 : vector<2x32xf32>
    %57 = math.tanh %56 : vector<2x32xf32>
    %58 = arith.mulf %51, %57 : vector<2x32xf32>
    %c0_22 = arith.constant 0 : index
    %59 = arith.index_cast %38 : i32 to index
    %c0_23 = arith.constant 0 : index
    %c0_24 = arith.constant 0 : index
    %60 = vector.load %arg6[%c0_22, %59, %c0_23, %c0_24] : memref<1x8x2x32xf32, #tpu.memory_space<vmem>>, vector<1x1x2x32xf32>
    %61 = vector.shape_cast %60 : vector<1x1x2x32xf32> to vector<2x32xf32>
    %62 = vector.shape_cast %58 : vector<2x32xf32> to vector<1x1x2x32xf32>
    tpu.vector_store %arg6[%c0_22, %59, %c0_23, %c0_24], %62 {strides = array<i32>} : memref<1x8x2x32xf32, #tpu.memory_space<vmem>>, vector<1x1x2x32xf32>,
    %c2_i32_25 = arith.constant 2 : i32
    %c2_i32_26 = arith.constant 2 : i32
    %63 = arith.muli %c2_i32_26, %c2_i32_25 : i32
    %c7_i32_27 = arith.constant 7 : i32
    %64 = arith.subi %c7_i32_27, %63 : i32
    %65 = arith.muli %arg0, %64 : i32
    %66 = arith.addi %c2_i32_25, %65 : i32
    %c0_28 = arith.constant 0 : index
    %67 = arith.index_cast %66 : i32 to index
    %c0_29 = arith.constant 0 : index
    %c0_30 = arith.constant 0 : index
    %68 = vector.load %arg2[%c0_28, %67, %c0_29, %c0_30] : memref<1x8x2x128xf32, #tpu.memory_space<vmem>>, vector<1x1x2x128xf32>
    %69 = vector.shape_cast %68 : vector<1x1x2x128xf32> to vector<2x128xf32>
    %cst_31 = arith.constant dense<0.000000e+00> : vector<2x128xf32>
    %70 = tpu.matmul %58, %4, %cst_31 {dimension_numbers = #tpu.dot_dimension_numbers<[1], [0], [0], [1], [0, 0, 1, 1], [], []>} : vector<2x32xf32>, vector<32x128xf32>, vector<2x128xf32> -> vector<2x128xf32>
    %71 = arith.addf %69, %70 : vector<2x128xf32>
    %72 = arith.negf %71 : vector<2x128xf32>
    %73 = math.exp %72 : vector<2x128xf32>
    %cst_32 = arith.constant 1.000000e+00 : f32
    %74 = vector.broadcast %cst_32 : f32 to vector<2x128xf32>
    %75 = arith.addf %74, %73 : vector<2x128xf32>
    %76 = arith.divf %74, %75 : vector<2x128xf32>
    %77 = vector.extract_strided_slice %76 {offsets = [0, 0], sizes = [2, 32], strides = [1, 1]} : vector<2x128xf32> to vector<2x32xf32>
    %78 = vector.extract_strided_slice %76 {offsets = [0, 32], sizes = [2, 32], strides = [1, 1]} : vector<2x128xf32> to vector<2x32xf32>
    %79 = vector.extract_strided_slice %76 {offsets = [0, 96], sizes = [2, 32], strides = [1, 1]} : vector<2x128xf32> to vector<2x32xf32>
    %80 = vector.extract_strided_slice %71 {offsets = [0, 64], sizes = [2, 32], strides = [1, 1]} : vector<2x128xf32> to vector<2x32xf32>
    %81 = math.tanh %80 : vector<2x32xf32>
    %82 = arith.mulf %78, %56 : vector<2x32xf32>
    %83 = arith.mulf %77, %81 : vector<2x32xf32>
    %84 = arith.addf %82, %83 : vector<2x32xf32>
    %85 = math.tanh %84 : vector<2x32xf32>
    %86 = arith.mulf %79, %85 : vector<2x32xf32>
    %c0_33 = arith.constant 0 : index
    %87 = arith.index_cast %66 : i32 to index
    %c0_34 = arith.constant 0 : index
    %c0_35 = arith.constant 0 : index
    %88 = vector.load %arg6[%c0_33, %87, %c0_34, %c0_35] : memref<1x8x2x32xf32, #tpu.memory_space<vmem>>, vector<1x1x2x32xf32>
    %89 = vector.shape_cast %88 : vector<1x1x2x32xf32> to vector<2x32xf32>
    %90 = vector.shape_cast %86 : vector<2x32xf32> to vector<1x1x2x32xf32>
    tpu.vector_store %arg6[%c0_33, %87, %c0_34, %c0_35], %90 {strides = array<i32>} : memref<1x8x2x32xf32, #tpu.memory_space<vmem>>, vector<1x1x2x32xf32>,
    %c3_i32 = arith.constant 3 : i32
    %c2_i32_36 = arith.constant 2 : i32
    %91 = arith.muli %c2_i32_36, %c3_i32 : i32
    %c7_i32_37 = arith.constant 7 : i32
    %92 = arith.subi %c7_i32_37, %91 : i32
    %93 = arith.muli %arg0, %92 : i32
    %94 = arith.addi %c3_i32, %93 : i32
    %c0_38 = arith.constant 0 : index
    %95 = arith.index_cast %94 : i32 to index
    %c0_39 = arith.constant 0 : index
    %c0_40 = arith.constant 0 : index
    %96 = vector.load %arg2[%c0_38, %95, %c0_39, %c0_40] : memref<1x8x2x128xf32, #tpu.memory_space<vmem>>, vector<1x1x2x128xf32>
    %97 = vector.shape_cast %96 : vector<1x1x2x128xf32> to vector<2x128xf32>
    %cst_41 = arith.constant dense<0.000000e+00> : vector<2x128xf32>
    %98 = tpu.matmul %86, %4, %cst_41 {dimension_numbers = #tpu.dot_dimension_numbers<[1], [0], [0], [1], [0, 0, 1, 1], [], []>} : vector<2x32xf32>, vector<32x128xf32>, vector<2x128xf32> -> vector<2x128xf32>
    %99 = arith.addf %97, %98 : vector<2x128xf32>
    %100 = arith.negf %99 : vector<2x128xf32>
    %101 = math.exp %100 : vector<2x128xf32>
    %cst_42 = arith.constant 1.000000e+00 : f32
    %102 = vector.broadcast %cst_42 : f32 to vector<2x128xf32>
    %103 = arith.addf %102, %101 : vector<2x128xf32>
    %104 = arith.divf %102, %103 : vector<2x128xf32>
    %105 = vector.extract_strided_slice %104 {offsets = [0, 0], sizes = [2, 32], strides = [1, 1]} : vector<2x128xf32> to vector<2x32xf32>
    %106 = vector.extract_strided_slice %104 {offsets = [0, 32], sizes = [2, 32], strides = [1, 1]} : vector<2x128xf32> to vector<2x32xf32>
    %107 = vector.extract_strided_slice %104 {offsets = [0, 96], sizes = [2, 32], strides = [1, 1]} : vector<2x128xf32> to vector<2x32xf32>
    %108 = vector.extract_strided_slice %99 {offsets = [0, 64], sizes = [2, 32], strides = [1, 1]} : vector<2x128xf32> to vector<2x32xf32>
    %109 = math.tanh %108 : vector<2x32xf32>
    %110 = arith.mulf %106, %84 : vector<2x32xf32>
    %111 = arith.mulf %105, %109 : vector<2x32xf32>
    %112 = arith.addf %110, %111 : vector<2x32xf32>
    %113 = math.tanh %112 : vector<2x32xf32>
    %114 = arith.mulf %107, %113 : vector<2x32xf32>
    %c0_43 = arith.constant 0 : index
    %115 = arith.index_cast %94 : i32 to index
    %c0_44 = arith.constant 0 : index
    %c0_45 = arith.constant 0 : index
    %116 = vector.load %arg6[%c0_43, %115, %c0_44, %c0_45] : memref<1x8x2x32xf32, #tpu.memory_space<vmem>>, vector<1x1x2x32xf32>
    %117 = vector.shape_cast %116 : vector<1x1x2x32xf32> to vector<2x32xf32>
    %118 = vector.shape_cast %114 : vector<2x32xf32> to vector<1x1x2x32xf32>
    tpu.vector_store %arg6[%c0_43, %115, %c0_44, %c0_45], %118 {strides = array<i32>} : memref<1x8x2x32xf32, #tpu.memory_space<vmem>>, vector<1x1x2x32xf32>,
    %c4_i32 = arith.constant 4 : i32
    %c2_i32_46 = arith.constant 2 : i32
    %119 = arith.muli %c2_i32_46, %c4_i32 : i32
    %c7_i32_47 = arith.constant 7 : i32
    %120 = arith.subi %c7_i32_47, %119 : i32
    %121 = arith.muli %arg0, %120 : i32
    %122 = arith.addi %c4_i32, %121 : i32
    %c0_48 = arith.constant 0 : index
    %123 = arith.index_cast %122 : i32 to index
    %c0_49 = arith.constant 0 : index
    %c0_50 = arith.constant 0 : index
    %124 = vector.load %arg2[%c0_48, %123, %c0_49, %c0_50] : memref<1x8x2x128xf32, #tpu.memory_space<vmem>>, vector<1x1x2x128xf32>
    %125 = vector.shape_cast %124 : vector<1x1x2x128xf32> to vector<2x128xf32>
    %cst_51 = arith.constant dense<0.000000e+00> : vector<2x128xf32>
    %126 = tpu.matmul %114, %4, %cst_51 {dimension_numbers = #tpu.dot_dimension_numbers<[1], [0], [0], [1], [0, 0, 1, 1], [], []>} : vector<2x32xf32>, vector<32x128xf32>, vector<2x128xf32> -> vector<2x128xf32>
    %127 = arith.addf %125, %126 : vector<2x128xf32>
    %128 = arith.negf %127 : vector<2x128xf32>
    %129 = math.exp %128 : vector<2x128xf32>
    %cst_52 = arith.constant 1.000000e+00 : f32
    %130 = vector.broadcast %cst_52 : f32 to vector<2x128xf32>
    %131 = arith.addf %130, %129 : vector<2x128xf32>
    %132 = arith.divf %130, %131 : vector<2x128xf32>
    %133 = vector.extract_strided_slice %132 {offsets = [0, 0], sizes = [2, 32], strides = [1, 1]} : vector<2x128xf32> to vector<2x32xf32>
    %134 = vector.extract_strided_slice %132 {offsets = [0, 32], sizes = [2, 32], strides = [1, 1]} : vector<2x128xf32> to vector<2x32xf32>
    %135 = vector.extract_strided_slice %132 {offsets = [0, 96], sizes = [2, 32], strides = [1, 1]} : vector<2x128xf32> to vector<2x32xf32>
    %136 = vector.extract_strided_slice %127 {offsets = [0, 64], sizes = [2, 32], strides = [1, 1]} : vector<2x128xf32> to vector<2x32xf32>
    %137 = math.tanh %136 : vector<2x32xf32>
    %138 = arith.mulf %134, %112 : vector<2x32xf32>
    %139 = arith.mulf %133, %137 : vector<2x32xf32>
    %140 = arith.addf %138, %139 : vector<2x32xf32>
    %141 = math.tanh %140 : vector<2x32xf32>
    %142 = arith.mulf %135, %141 : vector<2x32xf32>
    %c0_53 = arith.constant 0 : index
    %143 = arith.index_cast %122 : i32 to index
    %c0_54 = arith.constant 0 : index
    %c0_55 = arith.constant 0 : index
    %144 = vector.load %arg6[%c0_53, %143, %c0_54, %c0_55] : memref<1x8x2x32xf32, #tpu.memory_space<vmem>>, vector<1x1x2x32xf32>
    %145 = vector.shape_cast %144 : vector<1x1x2x32xf32> to vector<2x32xf32>
    %146 = vector.shape_cast %142 : vector<2x32xf32> to vector<1x1x2x32xf32>
    tpu.vector_store %arg6[%c0_53, %143, %c0_54, %c0_55], %146 {strides = array<i32>} : memref<1x8x2x32xf32, #tpu.memory_space<vmem>>, vector<1x1x2x32xf32>,
    %c5_i32 = arith.constant 5 : i32
    %c2_i32_56 = arith.constant 2 : i32
    %147 = arith.muli %c2_i32_56, %c5_i32 : i32
    %c7_i32_57 = arith.constant 7 : i32
    %148 = arith.subi %c7_i32_57, %147 : i32
    %149 = arith.muli %arg0, %148 : i32
    %150 = arith.addi %c5_i32, %149 : i32
    %c0_58 = arith.constant 0 : index
    %151 = arith.index_cast %150 : i32 to index
    %c0_59 = arith.constant 0 : index
    %c0_60 = arith.constant 0 : index
    %152 = vector.load %arg2[%c0_58, %151, %c0_59, %c0_60] : memref<1x8x2x128xf32, #tpu.memory_space<vmem>>, vector<1x1x2x128xf32>
    %153 = vector.shape_cast %152 : vector<1x1x2x128xf32> to vector<2x128xf32>
    %cst_61 = arith.constant dense<0.000000e+00> : vector<2x128xf32>
    %154 = tpu.matmul %142, %4, %cst_61 {dimension_numbers = #tpu.dot_dimension_numbers<[1], [0], [0], [1], [0, 0, 1, 1], [], []>} : vector<2x32xf32>, vector<32x128xf32>, vector<2x128xf32> -> vector<2x128xf32>
    %155 = arith.addf %153, %154 : vector<2x128xf32>
    %156 = arith.negf %155 : vector<2x128xf32>
    %157 = math.exp %156 : vector<2x128xf32>
    %cst_62 = arith.constant 1.000000e+00 : f32
    %158 = vector.broadcast %cst_62 : f32 to vector<2x128xf32>
    %159 = arith.addf %158, %157 : vector<2x128xf32>
    %160 = arith.divf %158, %159 : vector<2x128xf32>
    %161 = vector.extract_strided_slice %160 {offsets = [0, 0], sizes = [2, 32], strides = [1, 1]} : vector<2x128xf32> to vector<2x32xf32>
    %162 = vector.extract_strided_slice %160 {offsets = [0, 32], sizes = [2, 32], strides = [1, 1]} : vector<2x128xf32> to vector<2x32xf32>
    %163 = vector.extract_strided_slice %160 {offsets = [0, 96], sizes = [2, 32], strides = [1, 1]} : vector<2x128xf32> to vector<2x32xf32>
    %164 = vector.extract_strided_slice %155 {offsets = [0, 64], sizes = [2, 32], strides = [1, 1]} : vector<2x128xf32> to vector<2x32xf32>
    %165 = math.tanh %164 : vector<2x32xf32>
    %166 = arith.mulf %162, %140 : vector<2x32xf32>
    %167 = arith.mulf %161, %165 : vector<2x32xf32>
    %168 = arith.addf %166, %167 : vector<2x32xf32>
    %169 = math.tanh %168 : vector<2x32xf32>
    %170 = arith.mulf %163, %169 : vector<2x32xf32>
    %c0_63 = arith.constant 0 : index
    %171 = arith.index_cast %150 : i32 to index
    %c0_64 = arith.constant 0 : index
    %c0_65 = arith.constant 0 : index
    %172 = vector.load %arg6[%c0_63, %171, %c0_64, %c0_65] : memref<1x8x2x32xf32, #tpu.memory_space<vmem>>, vector<1x1x2x32xf32>
    %173 = vector.shape_cast %172 : vector<1x1x2x32xf32> to vector<2x32xf32>
    %174 = vector.shape_cast %170 : vector<2x32xf32> to vector<1x1x2x32xf32>
    tpu.vector_store %arg6[%c0_63, %171, %c0_64, %c0_65], %174 {strides = array<i32>} : memref<1x8x2x32xf32, #tpu.memory_space<vmem>>, vector<1x1x2x32xf32>,
    %c6_i32 = arith.constant 6 : i32
    %c2_i32_66 = arith.constant 2 : i32
    %175 = arith.muli %c2_i32_66, %c6_i32 : i32
    %c7_i32_67 = arith.constant 7 : i32
    %176 = arith.subi %c7_i32_67, %175 : i32
    %177 = arith.muli %arg0, %176 : i32
    %178 = arith.addi %c6_i32, %177 : i32
    %c0_68 = arith.constant 0 : index
    %179 = arith.index_cast %178 : i32 to index
    %c0_69 = arith.constant 0 : index
    %c0_70 = arith.constant 0 : index
    %180 = vector.load %arg2[%c0_68, %179, %c0_69, %c0_70] : memref<1x8x2x128xf32, #tpu.memory_space<vmem>>, vector<1x1x2x128xf32>
    %181 = vector.shape_cast %180 : vector<1x1x2x128xf32> to vector<2x128xf32>
    %cst_71 = arith.constant dense<0.000000e+00> : vector<2x128xf32>
    %182 = tpu.matmul %170, %4, %cst_71 {dimension_numbers = #tpu.dot_dimension_numbers<[1], [0], [0], [1], [0, 0, 1, 1], [], []>} : vector<2x32xf32>, vector<32x128xf32>, vector<2x128xf32> -> vector<2x128xf32>
    %183 = arith.addf %181, %182 : vector<2x128xf32>
    %184 = arith.negf %183 : vector<2x128xf32>
    %185 = math.exp %184 : vector<2x128xf32>
    %cst_72 = arith.constant 1.000000e+00 : f32
    %186 = vector.broadcast %cst_72 : f32 to vector<2x128xf32>
    %187 = arith.addf %186, %185 : vector<2x128xf32>
    %188 = arith.divf %186, %187 : vector<2x128xf32>
    %189 = vector.extract_strided_slice %188 {offsets = [0, 0], sizes = [2, 32], strides = [1, 1]} : vector<2x128xf32> to vector<2x32xf32>
    %190 = vector.extract_strided_slice %188 {offsets = [0, 32], sizes = [2, 32], strides = [1, 1]} : vector<2x128xf32> to vector<2x32xf32>
    %191 = vector.extract_strided_slice %188 {offsets = [0, 96], sizes = [2, 32], strides = [1, 1]} : vector<2x128xf32> to vector<2x32xf32>
    %192 = vector.extract_strided_slice %183 {offsets = [0, 64], sizes = [2, 32], strides = [1, 1]} : vector<2x128xf32> to vector<2x32xf32>
    %193 = math.tanh %192 : vector<2x32xf32>
    %194 = arith.mulf %190, %168 : vector<2x32xf32>
    %195 = arith.mulf %189, %193 : vector<2x32xf32>
    %196 = arith.addf %194, %195 : vector<2x32xf32>
    %197 = math.tanh %196 : vector<2x32xf32>
    %198 = arith.mulf %191, %197 : vector<2x32xf32>
    %c0_73 = arith.constant 0 : index
    %199 = arith.index_cast %178 : i32 to index
    %c0_74 = arith.constant 0 : index
    %c0_75 = arith.constant 0 : index
    %200 = vector.load %arg6[%c0_73, %199, %c0_74, %c0_75] : memref<1x8x2x32xf32, #tpu.memory_space<vmem>>, vector<1x1x2x32xf32>
    %201 = vector.shape_cast %200 : vector<1x1x2x32xf32> to vector<2x32xf32>
    %202 = vector.shape_cast %198 : vector<2x32xf32> to vector<1x1x2x32xf32>
    tpu.vector_store %arg6[%c0_73, %199, %c0_74, %c0_75], %202 {strides = array<i32>} : memref<1x8x2x32xf32, #tpu.memory_space<vmem>>, vector<1x1x2x32xf32>,
    %c7_i32_76 = arith.constant 7 : i32
    %c2_i32_77 = arith.constant 2 : i32
    %203 = arith.muli %c2_i32_77, %c7_i32_76 : i32
    %c7_i32_78 = arith.constant 7 : i32
    %204 = arith.subi %c7_i32_78, %203 : i32
    %205 = arith.muli %arg0, %204 : i32
    %206 = arith.addi %c7_i32_76, %205 : i32
    %c0_79 = arith.constant 0 : index
    %207 = arith.index_cast %206 : i32 to index
    %c0_80 = arith.constant 0 : index
    %c0_81 = arith.constant 0 : index
    %208 = vector.load %arg2[%c0_79, %207, %c0_80, %c0_81] : memref<1x8x2x128xf32, #tpu.memory_space<vmem>>, vector<1x1x2x128xf32>
    %209 = vector.shape_cast %208 : vector<1x1x2x128xf32> to vector<2x128xf32>
    %cst_82 = arith.constant dense<0.000000e+00> : vector<2x128xf32>
    %210 = tpu.matmul %198, %4, %cst_82 {dimension_numbers = #tpu.dot_dimension_numbers<[1], [0], [0], [1], [0, 0, 1, 1], [], []>} : vector<2x32xf32>, vector<32x128xf32>, vector<2x128xf32> -> vector<2x128xf32>
    %211 = arith.addf %209, %210 : vector<2x128xf32>
    %212 = arith.negf %211 : vector<2x128xf32>
    %213 = math.exp %212 : vector<2x128xf32>
    %cst_83 = arith.constant 1.000000e+00 : f32
    %214 = vector.broadcast %cst_83 : f32 to vector<2x128xf32>
    %215 = arith.addf %214, %213 : vector<2x128xf32>
    %216 = arith.divf %214, %215 : vector<2x128xf32>
    %217 = vector.extract_strided_slice %216 {offsets = [0, 0], sizes = [2, 32], strides = [1, 1]} : vector<2x128xf32> to vector<2x32xf32>
    %218 = vector.extract_strided_slice %216 {offsets = [0, 32], sizes = [2, 32], strides = [1, 1]} : vector<2x128xf32> to vector<2x32xf32>
    %219 = vector.extract_strided_slice %216 {offsets = [0, 96], sizes = [2, 32], strides = [1, 1]} : vector<2x128xf32> to vector<2x32xf32>
    %220 = vector.extract_strided_slice %211 {offsets = [0, 64], sizes = [2, 32], strides = [1, 1]} : vector<2x128xf32> to vector<2x32xf32>
    %221 = math.tanh %220 : vector<2x32xf32>
    %222 = arith.mulf %218, %196 : vector<2x32xf32>
    %223 = arith.mulf %217, %221 : vector<2x32xf32>
    %224 = arith.addf %222, %223 : vector<2x32xf32>
    %225 = math.tanh %224 : vector<2x32xf32>
    %226 = arith.mulf %219, %225 : vector<2x32xf32>
    %c0_84 = arith.constant 0 : index
    %227 = arith.index_cast %206 : i32 to index
    %c0_85 = arith.constant 0 : index
    %c0_86 = arith.constant 0 : index
    %228 = vector.load %arg6[%c0_84, %227, %c0_85, %c0_86] : memref<1x8x2x32xf32, #tpu.memory_space<vmem>>, vector<1x1x2x32xf32>
    %229 = vector.shape_cast %228 : vector<1x1x2x32xf32> to vector<2x32xf32>
    %230 = vector.shape_cast %226 : vector<2x32xf32> to vector<1x1x2x32xf32>
    tpu.vector_store %arg6[%c0_84, %227, %c0_85, %c0_86], %230 {strides = array<i32>} : memref<1x8x2x32xf32, #tpu.memory_space<vmem>>, vector<1x1x2x32xf32>,
    %c8_i32 = arith.constant 8 : i32
    %c0_87 = arith.constant 0 : index
    %c0_88 = arith.constant 0 : index
    %231 = vector.load %arg7[%c0_87, %c0_88] : memref<2x32xf32, #tpu.memory_space<vmem>>, vector<2x32xf32>
    tpu.vector_store %arg7[%c0_87, %c0_88], %226 {strides = array<i32>} : memref<2x32xf32, #tpu.memory_space<vmem>>, vector<2x32xf32>,
    %c0_89 = arith.constant 0 : index
    %c0_90 = arith.constant 0 : index
    %232 = vector.load %arg8[%c0_89, %c0_90] : memref<2x32xf32, #tpu.memory_space<vmem>>, vector<2x32xf32>
    tpu.vector_store %arg8[%c0_89, %c0_90], %224 {strides = array<i32>} : memref<2x32xf32, #tpu.memory_space<vmem>>, vector<2x32xf32>,
    return
  }
  func.func @transform_0(%arg0: i32, %arg1: i32) -> (i32, i32, i32, i32) {
    %c2_i32 = arith.constant 2 : i32
    %0 = arith.muli %c2_i32, %arg1 : i32
    %c0_i32 = arith.constant 0 : i32
    %1 = arith.subi %c0_i32, %0 : i32
    %2 = arith.muli %arg0, %1 : i32
    %3 = arith.addi %arg1, %2 : i32
    %c0_i32_0 = arith.constant 0 : i32
    %c0_i32_1 = arith.constant 0 : i32
    %c0_i32_2 = arith.constant 0 : i32
    return %arg0, %3, %c0_i32_0, %c0_i32_1 : i32, i32, i32, i32
  }
  func.func @transform_1(%arg0: i32, %arg1: i32) -> (i32, i32, i32) {
    %c0_i32 = arith.constant 0 : i32
    %c0_i32_0 = arith.constant 0 : i32
    %c0_i32_1 = arith.constant 0 : i32
    return %arg0, %c0_i32, %c0_i32_0 : i32, i32, i32
  }
  func.func @transform_2(%arg0: i32, %arg1: i32) -> (i32, i32, i32) {
    %c0_i32 = arith.constant 0 : i32
    %c0_i32_0 = arith.constant 0 : i32
    %c0_i32_1 = arith.constant 0 : i32
    return %arg0, %c0_i32, %c0_i32_0 : i32, i32, i32
  }
  func.func @transform_3(%arg0: i32, %arg1: i32) -> (i32, i32, i32) {
    %c0_i32 = arith.constant 0 : i32
    %c0_i32_0 = arith.constant 0 : i32
    %c0_i32_1 = arith.constant 0 : i32
    return %arg0, %c0_i32, %c0_i32_0 : i32, i32, i32
  }
  func.func @transform_4(%arg0: i32, %arg1: i32) -> (i32, i32, i32, i32) {
    %c2_i32 = arith.constant 2 : i32
    %0 = arith.muli %c2_i32, %arg1 : i32
    %c0_i32 = arith.constant 0 : i32
    %1 = arith.subi %c0_i32, %0 : i32
    %2 = arith.muli %arg0, %1 : i32
    %3 = arith.addi %arg1, %2 : i32
    %c0_i32_0 = arith.constant 0 : i32
    %c0_i32_1 = arith.constant 0 : i32
    %c0_i32_2 = arith.constant 0 : i32
    return %arg0, %3, %c0_i32_0, %c0_i32_1 : i32, i32, i32, i32
  }
}

</mosaic_0001>

<bundles_post_ra>
// kernel: tpu_custom_call.1
= control target key start
LH: loop header
LB: loop body
LE: loop exit
PB: predicated region body
PF: predicated region fallthrough
CT: control target
= control target key end

     0   :  { %9 = vsyncpa [#allocation5], 0  ;;  %s2396_s0 = inlined_call_operand.hbm [shape: f32[2,8,2,128], index: 0, kind: input, shape index: {}]   ;;  %s2397_s1 = inlined_call_operand.hbm [shape: f32[2,32,128], index: 1, kind: input, shape index: {}]   ;;  %s2398_s2 = inlined_call_operand.vmem [shape: f32[2,2,32], index: 2, kind: input, shape index: {}]   ;;  %s2399_s3 = inlined_call_operand.vmem [shape: f32[2,2,32], index: 3, kind: input, shape index: {}]   ;;  %s2400_s4 = inlined_call_operand.hbm [shape: f32[2,8,2,32], index: 4, kind: output, shape index: {}]  }
   0x1   :  { %11 = vsyncpa [#allocation5 + $0x1], 0 }
   0x2   :  { %12 = vsyncpa [#allocation8], 0 }
   0x3   :  { %14 = vsyncpa [#allocation8 + $0x1], 0 }
   0x4   :  { %15 = vsyncpa [#allocation6], 0 }
   0x5   :  { %17 = vsyncpa [#allocation6 + $0x1], 0  ;;  %s2008_s15 = smov 0   ;;  %s2010_s16 = smov 0  }
   0x6   :  { %s2012_s17 = smov 0   ;;  %s2014_s18 = smov 0  }
   0x7   :  { %s2016_s19 = smov 0   ;;  %s2018_s20 = smov 0  }
   0x8 LB: > { %s1437_s21 = sadd.s32 4294967295, %s1967_s20   ;;  %s1438_s22 = sadd.s32 4294967294, %s1967_s20   ;;  %s1967_s20 = sphi %s2018_s20, %s23_s20   ;;  %s1963_s19 = sphi %s2016_s19, %s2418_s19   ;;  %s1959_s18 = sphi %s2014_s18, %s2417_s18   ;;  %s1955_s17 = sphi %s2012_s17, %s2416_s17   ;;  %s1951_s16 = sphi %s2010_s16, %s2415_s16   ;;  %s1947_s15 = sphi %s2008_s15, %s2414_s15  }
   0x9   : > { %s35_s23 = sadd.s32 1, %s1963_s19  ;;  %s52_s24 = sadd.s32 1, %s1955_s17 }
   0xa   : > { %p37_p0 = scmp.ge.s32.totalorder %s35_s23, 2  ;;  %p59_p1 = scmp.ne.s32.totalorder %s1955_s17, %s1951_s16 }
   0xb   : > { %p60_p2 = scmp.eq.s32.totalorder %s1967_s20, 0  ;;  %p65_p3 = scmp.ne.s32.totalorder %s1951_s16, %s1947_s15 }
   0xc   : > { %s2420_s23 = smov (%p37_p0, %s35_s23), 0  ;;  %p66_p5 = scmp.eq.s32.totalorder %s1437_s21, 0 }
   0xd   : > { %p2049_p4 = por %p60_p2, %p59_p1  ;;  %s47_s26 = ssub.s32 %s1963_s19, %s2420_s23 }
   0xe   : > { %p177_p6 = scmp.eq.s32.totalorder %s1437_s21, 1  ;;  %p50_p7 = scmp.eq.s32.totalorder %s47_s26, 0 }
   0xf   : > { %p2055_p8 = por %p66_p5, %p65_p3  ;;  %p183_p10 = scmp.eq.s32.totalorder %s1438_s22, 1 }
  0x10   : > { %p2059_p9 = por %p177_p6, %p59_p1  ;;  %p1696_p13 = scmp.lt.s32.totalorder %s1967_s20, 2 }
  0x11   : > { %s2404_s27 = scalar_select %p2055_p8, 1, 0 }
  0x12   : > { %s2405_s28 = scalar_select %p2059_p9, 1, 0 }
  0x13   : > { %s2064_s29 = scalar_select %p50_p7, %s1955_s17, %s52_s24  }
  0x14   : > { %p2066_p11 = por %p183_p10, %p65_p3  ;;  %s2073_s5 = sand.u32 1, %s1955_s17  }
  0x15   : > { %s1441_s6 = sshll.u32 %s2073_s5, 4  ;;  %s1500_s7 = sshll.u32 %s1963_s19, 8 }
  0x16   : > { %s2406_s30 = scalar_select %p2066_p11, 1, 0 }
  0x17   : > { %s2080_s10 = scalar_lea.hbm %s2396_s0, %s1500_s7  ;;  %s207_s11 = scalar_lea.vmem [#allocation4], %s1441_s6 }
  0x18   : > { %s220_s12 = sshll.u32 %s207_s11, 4  ;;  %p2086_p0 = pnand %p1696_p13, %p2049_p4  ;;  %s2082_s12 = int_to_ptr.vmem [resolvable:$true] %s220_s12 }
  0x19   : > { %s204_s14 = scalar_lea.sflag [#allocation5], %s2073_s5  ;;  %s1821_s21 = scalar_lea.hbm %s2080_s10, 256 }
  0x1a   : > { %p1822_p2 = scmp.ne.s32.totalorder %s2080_s10, %s1821_s21  ;;  %p1823_p3 = pneg %p2086_p0 }
  0x1b   : > { %s1826_s25 = scalar_lea.hbm %s2396_s0, 512  ;;  %p1827_p4 = scmp.lt.u32.totalorder %s2080_s10, %s2396_s0 }
  0x1c   : > { %p1824_p5 = pnand %p1823_p3, %p1822_p2  ;;  %p1828_p7 = scmp.lt.u32.totalorder %s1826_s25, %s1821_s21 }
  0x1d   : > { %p1830_p13 = scmp.lt.u32.totalorder %s1821_s21, %s2080_s10 }
  0x1e   : > { %p1825_p6 = pneg %p1824_p5  ;;  %p1829_p10 = por %p1828_p7, %p1827_p4 }
  0x20   : > { %p1831_p12 = por %p1830_p13, %p1829_p10 }
  0x22   : > { %p1832_p1 = pnand %p1831_p12, %p1825_p6 }
  0x24   : > { %1835 = shalt.err (!%p1832_p1)
}
  0x25   : > { %s1836_s7 = scalar_lea.vmem %s2082_s12, 256  ;;  %s1969_s8 = smov [#allocation4]  }
  0x26   : > { %p1837_p2 = scmp.ne.s32.totalorder %s2082_s12, %s1836_s7  ;;  %s1841_s9 = sshll.u32 %s1969_s8, 4  ;;  %s1842_s9 = int_to_ptr.vmem [resolvable:$false] %s1841_s9 }
  0x27   : > { %s1843_s11 = scalar_lea.vmem %s1842_s9, 512  ;;  %p1844_p9 = scmp.lt.s32.totalorder %s2082_s12, %s1842_s9 }
  0x28   : > { %p1839_p5 = pnand %p1837_p2, %p1823_p3  ;;  %p1845_p4 = scmp.lt.s32.totalorder %s1843_s11, %s1836_s7 }
  0x2a   : > { %p1840_p11 = pneg %p1839_p5  ;;  %p1846_p7 = por %p1845_p4, %p1844_p9 }
  0x2c   : > { %p1847_p10 = pnand %p1846_p7, %p1840_p11 }
  0x2e   : > { %1850 = shalt.err (!%p1847_p10)
}
  0x2f   : > { %s1970_s21 = smov 32   ;;  %s1971_s22 = smov 2  }
  0x30   : > { %1688 = dma.hbm_to_vmem [thread:$0]  (!%p2086_p0), %s2080_s10, 256, %s2082_s12, %s204_s14, %s1970_s21, %s1970_s21, %s1971_s22  }
  0x31   : > { %p263_p12 = scmp.lt.s32.totalorder %s1967_s20, 3  ;;  %s1444_s24 = sshll.u32 %s2073_s5, 5 }
  0x32   : > { %s1501_s25 = sshll.u32 %s1963_s19, 9  ;;  %p2408_p9 = scmp.ge.s32.totalorder %s1967_s20, 1 }
  0x33   : > { %s2131_s8 = scalar_lea.hbm %s2397_s1, %s1501_s25  ;;  %s234_s9 = scalar_lea.vmem [#allocation7], %s1444_s24 }
  0x34   : > { %p2124_p11 = pnand %p2408_p9, %p263_p12  ;;  %s241_s11 = sshll.u32 %s234_s9, 4  ;;  %s2133_s11 = int_to_ptr.vmem [resolvable:$true] %s241_s11 }
  0x35   : > { %s231_s10 = scalar_lea.sflag [#allocation8], %s2073_s5  ;;  %s1851_s12 = scalar_lea.hbm %s2131_s8, 512 }
  0x36   : > { %p1852_p1 = scmp.ne.s32.totalorder %s2131_s8, %s1851_s12  ;;  %s1856_s22 = scalar_lea.hbm %s2397_s1, 1024 }
  0x37   : > { %p1857_p2 = scmp.lt.u32.totalorder %s2131_s8, %s2397_s1  ;;  %p1858_p5 = scmp.lt.u32.totalorder %s1856_s22, %s1851_s12 }
  0x38   : > { %p1854_p6 = pnand %p1852_p1, %p1823_p3  ;;  %p1860_p7 = scmp.lt.u32.totalorder %s1851_s12, %s2131_s8 }
  0x39   : > { %p1859_p4 = por %p1858_p5, %p1857_p2 }
  0x3a   : > { %p1855_p13 = pneg %p1854_p6 }
  0x3b   : > { %p1861_p10 = por %p1860_p7, %p1859_p4 }
  0x3d   : > { %p1862_p12 = pnand %p1861_p10, %p1855_p13 }
  0x3f   : > { %1865 = shalt.err (!%p1862_p12)
}
  0x40   : > { %s1866_s24 = scalar_lea.vmem %s2133_s11, 512  ;;  %s1972_s7 = smov [#allocation7]  }
  0x41   : > { %p1867_p9 = scmp.ne.s32.totalorder %s2133_s11, %s1866_s24  ;;  %s1871_s9 = sshll.u32 %s1972_s7, 4  ;;  %s1872_s9 = int_to_ptr.vmem [resolvable:$false] %s1871_s9 }
  0x42   : > { %s1873_s14 = scalar_lea.vmem %s1872_s9, 1024  ;;  %p1874_p8 = scmp.lt.s32.totalorder %s2133_s11, %s1872_s9 }
  0x43   : > { %p1869_p1 = pnand %p1867_p9, %p1823_p3  ;;  %p1875_p2 = scmp.lt.s32.totalorder %s1873_s14, %s1866_s24 }
  0x45   : > { %p1870_p6 = pneg %p1869_p1  ;;  %p1876_p5 = por %p1875_p2, %p1874_p8 }
  0x47   : > { %p1877_p4 = pnand %p1876_p5, %p1870_p6 }
  0x49   : > { %1880 = shalt.err (!%p1877_p4)
}
  0x4a   : > { %s1973_s12 = smov 128   ;;  %s1974_s21 = smov 8  }
  0x4b   : > { %1691 = dma.hbm_to_vmem [thread:$0]  (!%p2086_p0), %s2131_s8, 512, %s2133_s11, %s231_s10, %s1973_s12, %s1973_s12, %s1974_s21  }
  0x4c   : > { %267 = sbr.rel (%p2124_p11) target bundleno = 5733 (0x1665), region = 36  ;;  %s2164_s22 = sand.u32 (!%p2124_p11), 1, %s1951_s16  }
  0x4d   : > { %s1448_s25 = sshll.u32 (!%p2124_p11), %s2164_s22, 4  ;;  %s270_s6 = scalar_lea.sflag (!%p2124_p11), [#allocation5], %s2164_s22 }
  0x4e   : > { %s2170_s24 = scalar_lea.vmem (!%p2124_p11), [#allocation4], %s1448_s25  ;;  %p2410_p8 = scmp.ne.s32.totalorder (!%p2124_p11), %s2404_s27, 0 }
  0x53   : > { %1934 = dma.done.wait (%p2410_p8), %s270_s6, 256  }
  0x54   : > { %1936 = vsyncadd (%p2410_p8), %s270_s6, 4294967040  ;;  %s1449_s5 = sshll.u32 %s2164_s22, 5  ;;  %s279_s13 = scalar_lea.sflag [#allocation8], %s2164_s22 }
  0x55   : > { %s282_s26 = scalar_lea.vmem [#allocation7], %s1449_s5 }
  0x56   : > { %1938 = dma.done.wait (%p2410_p8), %s279_s13, 512  }
  0x57   : > { %1940 = vsyncadd (%p2410_p8), %s279_s13, 4294966784  ;;  %p325_p0 = scmp.lt.s32.totalorder %s1959_s18, 1  ;;  %v1975_v0 = vmov 0.0|0.0   ;;  %vm1976_vm0 = vmmov 0   ;;  %v1977_v1 = vmov 0.0   ;;  %vm343_vm1 = vcmask 254976  }
  0x58   : > { %1631 = vmatprep.subr.bf16.mxu0 %v1975_v0  ;;  %1551 = vmatprep.mubr.msk.f32.mxu0 %vm1976_vm0, %v1977_v1  ;;  %v347_v2 = vld [vmem:[%s282_s26] sm:$0xff]  ;;  %v348_v3 = vld [vmem:[%s282_s26 + $0x8] sm:$0xff]  ;;  %v349_v4 = vld [vmem:[%s282_s26 + $0x10] sm:$0xff]  ;;  %vm357_vm2 = vcmask 261120   ;;  %s1453_s21 = smul.u32 14, %s1959_s18  ;;  %s1978_s5 = smov 64  }
  0x59   : > { %s2187_s8 = scalar_select %p325_p0, %s1959_s18, 1  ;;  %1637 = vmatprep.subr.bf16.mxu1 %v1975_v0  ;;  %1562 = vmatprep.mubr.msk.f32.mxu1 %vm1976_vm0, %v1977_v1  ;;  %v2196_v5 = vpack.c.bf16 %v348_v3, %v347_v2  ;;  %v350_v6 = vld [vmem:[%s282_s26 + $0x18] sm:$0xff] }
  0x5a   : > { %v2200_v8 = vpack.c.bf16 %v350_v6, %v349_v4  ;;  %s355_s6 = scalar_lea.vmem %s2170_s24, %s1453_s21 [#allocation4]  ;;  %s1979_s13 = smov 32  }
  0x5b   : > { %s1451_s27 = sshll.u32 %s2187_s8, 1  ;;  %1633 = vmatpush3.bf16.msra.mxu0 %v2196_v5  ;;  %1639 = vmatpush3.bf16.msra.mxu1 %v2196_v5  ;;  %v356_v11 = vld [vmem:[%s355_s6] sm:$0x3]  ;;  %s2231_s26 = scalar_lea.vmem [#allocation9], %s1448_s25 }
  0x5c   : > { %s328_s7 = scalar_lea.vmem %s2398_s2, %s1451_s27  ;;  %1634 = vmatprep.subr.bf16.mxu0 %v1975_v0  ;;  %1640 = vmatprep.subr.bf16.mxu1 %v1975_v0  ;;  %s332_s12 = scalar_lea.vmem %s2399_s3, %s1451_s27 }
  0x5d   : > { %v342_v7 = vld [vmem:[%s328_s7] sm:$0x3]  ;;  %s464_s8 = scalar_lea.vmem %s2231_s26, %s1453_s21 [#allocation9]  ;;  %s1456_s25 = smul.u32 10, %s1959_s18 }
  0x5e   : > { %344 = vst.msk [vmem:[#allocation2] sm:$0x3] %vm343_vm1, %v342_v7  ;;  %v345_v10 = vld [vmem:[%s332_s12] sm:$0x3]  ;;  %s1462_s10 = smul.u32 6, %s1959_s18  ;;  %s1468_s14 = sshll.u32 %s1959_s18, 1 }
  0x5f   : > { %1636 = vmatpush3.bf16.msra.mxu0 %v2200_v8  ;;  %1642 = vmatpush3.bf16.msra.mxu1 %v2200_v8  ;;  %346 = vst.msk [vmem:[#allocation3] sm:$0x3] %vm343_vm1, %v345_v10  ;;  %s1324_s27 = scalar_lea.vmem %s2170_s24, %s1456_s25 [#allocation4]  ;;  %s1328_s11 = scalar_lea.vmem %s2231_s26, %s1456_s25 [#allocation9] }
  0x60   : > { %1643 = vmatprep.subr.bf16.mxu0 %v1975_v0  ;;  %1649 = vmatprep.subr.bf16.mxu1 %v1975_v0  ;;  %v1457_v31 = vld [vmem:[%s1324_s27 + $0x2] sm:$0x3]  ;;  %s1332_s7 = scalar_lea.vmem %s2170_s24, %s1462_s10 [#allocation4]  ;;  %s1336_s9 = scalar_lea.vmem %s2231_s26, %s1462_s10 [#allocation9] }
  0x61   : > { %v1463_v49 = vld [vmem:[%s1332_s7 + $0x4] sm:$0x3]  ;;  %s1339_s12 = scalar_lea.vmem %s2170_s24, %s1468_s14 [#allocation4]  ;;  %s1342_s21 = scalar_lea.vmem %s2231_s26, %s1468_s14 [#allocation9] }
  0x62   : > { %v1469_v6 = vld [vmem:[%s1339_s12 + $0x6] sm:$0x3]  ;;  %s790_s6 = ssub.s32 4, %s1959_s18  ;;  %p2411_p11 = scmp.ne.s32.totalorder %s2405_s28, 0 }
  0x65   : > { %v351_v9 = vld [vmem:[#allocation2] sm:$0x3] }
  0x66   : > { %1552 = vmatmul.mubr.msk.f32.vlgmr.msra.gmra.mrb[0].mxu0 %vm357_vm2, %v351_v9  ;;  %v352_v16 = vld [vmem:[#allocation3] sm:$0x3] }
  0x67   : > { %1645 = vmatpush3.bf16.msra.mxu0 %v2196_v5  ;;  %1573 = vmatprep.mubr.msk.f32.mxu0 %vm1976_vm0, %v1977_v1 }
  0x68   : > { %1646 = vmatprep.subr.bf16.mxu0 %v1975_v0 }
  0x6b   : > { %1648 = vmatpush3.bf16.msra.mxu0 %v2200_v8 }
  0x6c   : > { %1655 = vmatprep.subr.bf16.mxu0 %v1975_v0 }
 0x139   : > { %v427_v12 = vpop.f32.mrb[0].mxu0 }
 0x13a   : > { %v431_v13 = vadd.f32 %v427_v12, %v356_v11  ;;  %v1553_v14 = vpop.f32.mrb[1].mxu0 }
 0x13c   : > { %1757 = vtanh.f32 %v431_v13  ;;  %v1455_v17 = vmul.f32 -1.442695, %v431_v13 }
 0x13e   : > { %1759 = vpow2.f32 %v1455_v17 }
 0x146   : > { %v1758_v15 = vpop.eup %1757 }
 0x147   : > { %445 = vrot.lane.b32.xlu0 %v1758_v15, %s1978_s5 }
 0x148   : > { %v1760_v18 = vpop.eup %1759 }
 0x149   : > { %v435_v19 = vadd.f32 1.0, %v1760_v18 }
 0x14b   : > { %440 = vrot.lane.b32.xlu0 %v352_v16, %s1979_s13  ;;  %1761 = vrcp.f32 %v435_v19 }
 0x155   : > { %v1762_v20 = vpop.eup %1761 }
 0x1b9   : > { %v446_v21 = vpop.permute.xlu0 %445 }
 0x1ba   : > { %v448_v22 = vmul.f32 %v1762_v20, %v446_v21 }
 0x1bc   : > { %450 = vrot.lane.b32.xlu1 %v448_v22, %s1979_s13 }
 0x1bd   : > { %v441_v23 = vpop.permute.xlu0 %440 }
 0x1be   : > { %v443_v24 = vmul.f32 %v1762_v20, %v441_v23 }
 0x22e   : > { %v451_v25 = vpop.permute.xlu1 %450 }
 0x22f   : > { %v453_v26 = vadd.f32 %v451_v25, %v443_v24 }
 0x231   : > { %1763 = vtanh.f32 %v453_v26 }
 0x23b   : > { %v1764_v27 = vpop.eup %1763 }
 0x23c   : > { %456 = vrot.lane.b32.xlu1 %v1764_v27, %s1978_s5 }
 0x2ae   : > { %v457_v28 = vpop.permute.xlu1 %456 }
 0x2af   : > { %v459_v29 = vmul.f32 %v1762_v20, %v457_v28 }
 0x2b1   : > { %461 = vrot.lane.b32.xlu0 %v459_v29, %s1979_s13 }
 0x323   : > { %v462_v30 = vpop.permute.xlu0 %461 }
 0x324   : > { %466 = vst.msk [vmem:[%s464_s8] sm:$0x3] %vm343_vm1, %v462_v30  ;;  %1563 = vmatmul.mubr.msk.f32.vlgmr.msra.gmra.mrb[0].mxu1 %vm357_vm2, %v462_v30  ;;  %s2289_s8 = sshll.u32 %s790_s6, 1 }
 0x325   : > { %1651 = vmatpush3.bf16.msra.mxu1 %v2196_v5  ;;  %1584 = vmatprep.mubr.msk.f32.mxu1 %vm1976_vm0, %v1977_v1  ;;  %s792_s25 = scalar_lea.vmem %s2170_s24, %s2289_s8 [#allocation4]  ;;  %s895_s27 = scalar_lea.vmem %s2231_s26, %s2289_s8 [#allocation9] }
 0x326   : > { %1652 = vmatprep.subr.bf16.mxu1 %v1975_v0  ;;  %v793_v25 = vld [vmem:[%s792_s25] sm:$0x3]  ;;  %s1247_s8 = sshll.u32 %s2231_s26, 4  ;;  %s1502_s25 = sshll.u32 %s1959_s18, 8  ;;  %s2335_s8 = int_to_ptr.vmem [resolvable:$true] %s1247_s8 }
 0x329   : > { %1654 = vmatpush3.bf16.msra.mxu1 %v2200_v8 }
 0x32a   : > { %1661 = vmatprep.subr.bf16.mxu1 %v1975_v0 }
 0x3f7   : > { %v540_v32 = vpop.f32.mrb[0].mxu1 }
 0x3f8   : > { %v544_v33 = vadd.f32 %v1457_v31, %v540_v32  ;;  %v1564_v34 = vpop.f32.mrb[1].mxu1 }
 0x3fa   : > { %1765 = vtanh.f32 %v544_v33  ;;  %v1459_v36 = vmul.f32 -1.442695, %v544_v33 }
 0x3fc   : > { %1767 = vpow2.f32 %v1459_v36 }
 0x404   : > { %v1766_v35 = vpop.eup %1765 }
 0x405   : > { %554 = vrot.lane.b32.xlu1 %v1766_v35, %s1978_s5 }
 0x406   : > { %v1768_v37 = vpop.eup %1767 }
 0x407   : > { %v548_v38 = vadd.f32 1.0, %v1768_v37 }
 0x409   : > { %1769 = vrcp.f32 %v548_v38 }
 0x413   : > { %v1770_v39 = vpop.eup %1769 }
 0x414   : > { %v552_v42 = vmul.f32 %v1770_v39, %v453_v26 }
 0x477   : > { %v555_v40 = vpop.permute.xlu1 %554 }
 0x478   : > { %v557_v41 = vmul.f32 %v1770_v39, %v555_v40 }
 0x47a   : > { %559 = vrot.lane.b32.xlu0 %v557_v41, %s1979_s13 }
 0x4ec   : > { %v560_v43 = vpop.permute.xlu0 %559 }
 0x4ed   : > { %v562_v44 = vadd.f32 %v560_v43, %v552_v42 }
 0x4ef   : > { %1771 = vtanh.f32 %v562_v44 }
 0x4f9   : > { %v1772_v45 = vpop.eup %1771 }
 0x4fa   : > { %565 = vrot.lane.b32.xlu1 %v1772_v45, %s1978_s5 }
 0x56c   : > { %v566_v46 = vpop.permute.xlu1 %565 }
 0x56d   : > { %v568_v47 = vmul.f32 %v1770_v39, %v566_v46 }
 0x56f   : > { %570 = vrot.lane.b32.xlu0 %v568_v47, %s1979_s13 }
 0x5e1   : > { %v571_v48 = vpop.permute.xlu0 %570 }
 0x5e2   : > { %1461 = vst.msk [vmem:[%s1328_s11 + $0x2] sm:$0x3] %vm343_vm1, %v571_v48  ;;  %1574 = vmatmul.mubr.msk.f32.vlgmr.msra.gmra.mrb[2].mxu0 %vm357_vm2, %v571_v48  ;;  %s1477_s11 = smul.u32 4294967290, %s1959_s18 }
 0x5e3   : > { %1657 = vmatpush3.bf16.msra.mxu0 %v2196_v5  ;;  %1595 = vmatprep.mubr.msk.f32.mxu0 %vm1976_vm0, %v1977_v1 }
 0x5e4   : > { %1658 = vmatprep.subr.bf16.mxu0 %v1975_v0  ;;  %s1350_s10 = scalar_lea.vmem %s2170_s24, %s1477_s11 [#allocation4]  ;;  %s1354_s7 = scalar_lea.vmem %s2231_s26, %s1477_s11 [#allocation9] }
 0x5e5   : > { %v1478_v43 = vld [vmem:[%s1350_s10 + $0xa] sm:$0x3]  ;;  %s2343_s10 = scalar_lea.hbm %s2400_s4, %s1502_s25 }
 0x5e7   : > { %1660 = vmatpush3.bf16.msra.mxu0 %v2200_v8 }
 0x5e8   : > { %1667 = vmatprep.subr.bf16.mxu0 %v1975_v0 }
 0x6b5   : > { %v648_v50 = vpop.f32.mrb[2].mxu0 }
 0x6b6   : > { %v652_v51 = vadd.f32 %v1463_v49, %v648_v50  ;;  %v1575_v52 = vpop.f32.mrb[3].mxu0 }
 0x6b8   : > { %1773 = vtanh.f32 %v652_v51  ;;  %v1465_v54 = vmul.f32 -1.442695, %v652_v51 }
 0x6ba   : > { %1775 = vpow2.f32 %v1465_v54 }
 0x6c2   : > { %v1774_v53 = vpop.eup %1773 }
 0x6c3   : > { %662 = vrot.lane.b32.xlu1 %v1774_v53, %s1978_s5 }
 0x6c4   : > { %v1776_v55 = vpop.eup %1775 }
 0x6c5   : > { %v656_v56 = vadd.f32 1.0, %v1776_v55 }
 0x6c7   : > { %1777 = vrcp.f32 %v656_v56 }
 0x6d1   : > { %v1778_v57 = vpop.eup %1777 }
 0x6d2   : > { %v660_v60 = vmul.f32 %v1778_v57, %v562_v44 }
 0x735   : > { %v663_v58 = vpop.permute.xlu1 %662 }
 0x736   : > { %v665_v59 = vmul.f32 %v1778_v57, %v663_v58 }
 0x738   : > { %667 = vrot.lane.b32.xlu0 %v665_v59, %s1979_s13 }
 0x7aa   : > { %v668_v61 = vpop.permute.xlu0 %667 }
 0x7ab   : > { %v670_v62 = vadd.f32 %v668_v61, %v660_v60 }
 0x7ad   : > { %1779 = vtanh.f32 %v670_v62 }
 0x7b7   : > { %v1780_v63 = vpop.eup %1779 }
 0x7b8   : > { %673 = vrot.lane.b32.xlu1 %v1780_v63, %s1978_s5 }
 0x82a   : > { %v674_v2 = vpop.permute.xlu1 %673 }
 0x82b   : > { %v676_v3 = vmul.f32 %v1778_v57, %v674_v2 }
 0x82d   : > { %678 = vrot.lane.b32.xlu0 %v676_v3, %s1979_s13 }
 0x89f   : > { %v679_v4 = vpop.permute.xlu0 %678 }
 0x8a0   : > { %1467 = vst.msk [vmem:[%s1336_s9 + $0x4] sm:$0x3] %vm343_vm1, %v679_v4  ;;  %1585 = vmatmul.mubr.msk.f32.vlgmr.msra.gmra.mrb[2].mxu1 %vm357_vm2, %v679_v4  ;;  %s1483_s9 = smul.u32 4294967286, %s1959_s18 }
 0x8a1   : > { %1663 = vmatpush3.bf16.msra.mxu1 %v2196_v5  ;;  %1606 = vmatprep.mubr.msk.f32.mxu1 %vm1976_vm0, %v1977_v1 }
 0x8a2   : > { %1664 = vmatprep.subr.bf16.mxu1 %v1975_v0  ;;  %s1358_s14 = scalar_lea.vmem %s2170_s24, %s1483_s9 [#allocation4]  ;;  %s1362_s12 = scalar_lea.vmem %s2231_s26, %s1483_s9 [#allocation9] }
 0x8a3   : > { %v1484_v57 = vld [vmem:[%s1358_s14 + $0xc] sm:$0x3]  ;;  %s1881_s9 = scalar_lea.vmem %s2335_s8, 256 }
 0x8a4   : > { %p1882_p3 = scmp.ne.s32.totalorder %s2335_s8, %s1881_s9 }
 0x8a5   : > { %1666 = vmatpush3.bf16.msra.mxu1 %v2200_v8 }
 0x8a6   : > { %1673 = vmatprep.subr.bf16.mxu1 %v1975_v0  ;;  %p1883_p13 = pnand %p1882_p3, %p2411_p11 }
 0x8a8   : > { %p1884_p7 = pneg %p1883_p13 }
 0x973   : > { %v755_v7 = vpop.f32.mrb[2].mxu1 }
 0x974   : > { %v759_v9 = vadd.f32 %v1469_v6, %v755_v7  ;;  %v1586_v10 = vpop.f32.mrb[3].mxu1 }
 0x976   : > { %1781 = vtanh.f32 %v759_v9  ;;  %v1471_v12 = vmul.f32 -1.442695, %v759_v9 }
 0x978   : > { %1783 = vpow2.f32 %v1471_v12 }
 0x980   : > { %v1782_v11 = vpop.eup %1781 }
 0x981   : > { %769 = vrot.lane.b32.xlu1 %v1782_v11, %s1978_s5 }
 0x982   : > { %v1784_v13 = vpop.eup %1783 }
 0x983   : > { %v763_v14 = vadd.f32 1.0, %v1784_v13 }
 0x985   : > { %1785 = vrcp.f32 %v763_v14 }
 0x98f   : > { %v1786_v15 = vpop.eup %1785 }
 0x990   : > { %v767_v18 = vmul.f32 %v1786_v15, %v670_v62 }
 0x9f3   : > { %v770_v16 = vpop.permute.xlu1 %769 }
 0x9f4   : > { %v772_v17 = vmul.f32 %v1786_v15, %v770_v16 }
 0x9f6   : > { %774 = vrot.lane.b32.xlu0 %v772_v17, %s1979_s13 }
 0xa68   : > { %v775_v19 = vpop.permute.xlu0 %774 }
 0xa69   : > { %v777_v20 = vadd.f32 %v775_v19, %v767_v18 }
 0xa6b   : > { %1787 = vtanh.f32 %v777_v20 }
 0xa75   : > { %v1788_v21 = vpop.eup %1787 }
 0xa76   : > { %780 = vrot.lane.b32.xlu1 %v1788_v21, %s1978_s5 }
 0xae8   : > { %v781_v22 = vpop.permute.xlu1 %780 }
 0xae9   : > { %v783_v23 = vmul.f32 %v1786_v15, %v781_v22 }
 0xaeb   : > { %785 = vrot.lane.b32.xlu0 %v783_v23, %s1979_s13 }
 0xb5d   : > { %v786_v24 = vpop.permute.xlu0 %785 }
 0xb5e   : > { %1473 = vst.msk [vmem:[%s1342_s21 + $0x6] sm:$0x3] %vm343_vm1, %v786_v24  ;;  %1596 = vmatmul.mubr.msk.f32.vlgmr.msra.gmra.mrb[4].mxu0 %vm357_vm2, %v786_v24  ;;  %s1489_s21 = smul.u32 4294967282, %s1959_s18  ;;  %s1981_s18 = smov [#allocation9]  }
 0xb5f   : > { %1669 = vmatpush3.bf16.msra.mxu0 %v2196_v5  ;;  %1617 = vmatprep.mubr.msk.f32.mxu0 %vm1976_vm0, %v1977_v1  ;;  %s1885_s14 = sshll.u32 %s1981_s18, 4  ;;  %s1886_s14 = int_to_ptr.vmem [resolvable:$false] %s1885_s14 }
 0xb60   : > { %1670 = vmatprep.subr.bf16.mxu0 %v1975_v0  ;;  %s1366_s6 = scalar_lea.vmem %s2170_s24, %s1489_s21 [#allocation4]  ;;  %s1980_s24 = smov 96  }
 0xb61   : > { %v1490_v15 = vld [vmem:[%s1366_s6 + $0xe] sm:$0x3]  ;;  %p1888_p10 = scmp.lt.s32.totalorder %s2335_s8, %s1886_s14 }
 0xb63   : > { %1672 = vmatpush3.bf16.msra.mxu0 %v2200_v8 }
 0xc31   : > { %v862_v26 = vpop.f32.mrb[4].mxu0 }
 0xc32   : > { %v866_v27 = vadd.f32 %v862_v26, %v793_v25  ;;  %v1597_v28 = vpop.f32.mrb[5].mxu0 }
 0xc34   : > { %1789 = vtanh.f32 %v866_v27  ;;  %v1476_v30 = vmul.f32 -1.442695, %v866_v27 }
 0xc36   : > { %1791 = vpow2.f32 %v1476_v30 }
 0xc3e   : > { %v1790_v29 = vpop.eup %1789 }
 0xc3f   : > { %876 = vrot.lane.b32.xlu1 %v1790_v29, %s1978_s5 }
 0xc40   : > { %v1792_v31 = vpop.eup %1791 }
 0xc41   : > { %v870_v32 = vadd.f32 1.0, %v1792_v31 }
 0xc43   : > { %1793 = vrcp.f32 %v870_v32 }
 0xc4d   : > { %v1794_v33 = vpop.eup %1793 }
 0xc4e   : > { %v874_v36 = vmul.f32 %v1794_v33, %v777_v20 }
 0xcb1   : > { %v877_v34 = vpop.permute.xlu1 %876 }
 0xcb2   : > { %v879_v35 = vmul.f32 %v1794_v33, %v877_v34 }
 0xcb4   : > { %881 = vrot.lane.b32.xlu0 %v879_v35, %s1979_s13 }
 0xd26   : > { %v882_v37 = vpop.permute.xlu0 %881 }
 0xd27   : > { %v884_v38 = vadd.f32 %v882_v37, %v874_v36 }
 0xd29   : > { %1795 = vtanh.f32 %v884_v38 }
 0xd33   : > { %v1796_v39 = vpop.eup %1795 }
 0xd34   : > { %887 = vrot.lane.b32.xlu1 %v1796_v39, %s1978_s5 }
 0xda6   : > { %v888_v40 = vpop.permute.xlu1 %887 }
 0xda7   : > { %v890_v41 = vmul.f32 %v1794_v33, %v888_v40 }
 0xda9   : > { %892 = vrot.lane.b32.xlu0 %v890_v41, %s1979_s13 }
 0xe1b   : > { %v893_v42 = vpop.permute.xlu0 %892 }
 0xe1c   : > { %896 = vst.msk [vmem:[%s895_s27] sm:$0x3] %vm343_vm1, %v893_v42  ;;  %1607 = vmatmul.mubr.msk.f32.vlgmr.msra.gmra.mrb[4].mxu1 %vm357_vm2, %v893_v42 }
 0xe1d   : > { %1675 = vmatpush3.bf16.msra.mxu1 %v2196_v5  ;;  %1628 = vmatprep.mubr.msk.f32.mxu1 %vm1976_vm0, %v1977_v1 }
 0xe1e   : > { %1676 = vmatprep.subr.bf16.mxu1 %v1975_v0 }
 0xe21   : > { %1678 = vmatpush3.bf16.msra.mxu1 %v2200_v8 }
 0xeef   : > { %v970_v44 = vpop.f32.mrb[4].mxu1 }
 0xef0   : > { %v974_v45 = vadd.f32 %v1478_v43, %v970_v44  ;;  %v1608_v46 = vpop.f32.mrb[5].mxu1 }
 0xef2   : > { %1797 = vtanh.f32 %v974_v45  ;;  %v1480_v48 = vmul.f32 -1.442695, %v974_v45 }
 0xef4   : > { %1799 = vpow2.f32 %v1480_v48 }
 0xefc   : > { %v1798_v47 = vpop.eup %1797 }
 0xefd   : > { %984 = vrot.lane.b32.xlu1 %v1798_v47, %s1978_s5 }
 0xefe   : > { %v1800_v5 = vpop.eup %1799 }
 0xeff   : > { %v978_v49 = vadd.f32 1.0, %v1800_v5 }
 0xf01   : > { %1801 = vrcp.f32 %v978_v49 }
 0xf0b   : > { %v1802_v1 = vpop.eup %1801 }
 0xf0c   : > { %v982_v50 = vmul.f32 %v1802_v1, %v884_v38 }
 0xf6f   : > { %v985_v0 = vpop.permute.xlu1 %984 }
 0xf70   : > { %v987_v8 = vmul.f32 %v1802_v1, %v985_v0 }
 0xf72   : > { %989 = vrot.lane.b32.xlu0 %v987_v8, %s1979_s13 }
 0xfe4   : > { %v990_v51 = vpop.permute.xlu0 %989 }
 0xfe5   : > { %v992_v52 = vadd.f32 %v990_v51, %v982_v50 }
 0xfe7   : > { %1803 = vtanh.f32 %v992_v52 }
 0xff1   : > { %v1804_v53 = vpop.eup %1803 }
 0xff2   : > { %995 = vrot.lane.b32.xlu1 %v1804_v53, %s1978_s5 }
0x1064   : > { %v996_v54 = vpop.permute.xlu1 %995 }
0x1065   : > { %v998_v55 = vmul.f32 %v1802_v1, %v996_v54 }
0x1067   : > { %1000 = vrot.lane.b32.xlu0 %v998_v55, %s1979_s13 }
0x10d9   : > { %v1001_v56 = vpop.permute.xlu0 %1000 }
0x10da   : > { %1482 = vst.msk [vmem:[%s1354_s7 + $0xa] sm:$0x3] %vm343_vm1, %v1001_v56  ;;  %1618 = vmatmul.mubr.msk.f32.vlgmr.msra.gmra.mrb[6].mxu0 %vm357_vm2, %v1001_v56  ;;  %s1228_s7 = scalar_lea.sflag [#allocation6], %s2164_s22 }
0x11ad   : > { %v1078_v58 = vpop.f32.mrb[6].mxu0 }
0x11ae   : > { %v1082_v59 = vadd.f32 %v1484_v57, %v1078_v58  ;;  %v1619_v60 = vpop.f32.mrb[7].mxu0 }
0x11b0   : > { %1805 = vtanh.f32 %v1082_v59  ;;  %v1486_v62 = vmul.f32 -1.442695, %v1082_v59 }
0x11b2   : > { %1807 = vpow2.f32 %v1486_v62 }
0x11ba   : > { %v1806_v61 = vpop.eup %1805 }
0x11bb   : > { %1092 = vrot.lane.b32.xlu1 %v1806_v61, %s1978_s5 }
0x11bc   : > { %v1808_v63 = vpop.eup %1807 }
0x11bd   : > { %v1086_v2 = vadd.f32 1.0, %v1808_v63 }
0x11bf   : > { %1809 = vrcp.f32 %v1086_v2 }
0x11c9   : > { %v1810_v3 = vpop.eup %1809 }
0x11ca   : > { %v1090_v7 = vmul.f32 %v1810_v3, %v992_v52 }
0x122d   : > { %v1093_v4 = vpop.permute.xlu1 %1092 }
0x122e   : > { %v1095_v6 = vmul.f32 %v1810_v3, %v1093_v4 }
0x1230   : > { %1097 = vrot.lane.b32.xlu0 %v1095_v6, %s1979_s13 }
0x12a2   : > { %v1098_v9 = vpop.permute.xlu0 %1097 }
0x12a3   : > { %v1100_v10 = vadd.f32 %v1098_v9, %v1090_v7 }
0x12a5   : > { %1811 = vtanh.f32 %v1100_v10 }
0x12af   : > { %v1812_v11 = vpop.eup %1811 }
0x12b0   : > { %1103 = vrot.lane.b32.xlu1 %v1812_v11, %s1978_s5 }
0x1322   : > { %v1104_v12 = vpop.permute.xlu1 %1103 }
0x1323   : > { %v1106_v13 = vmul.f32 %v1810_v3, %v1104_v12 }
0x1325   : > { %1108 = vrot.lane.b32.xlu0 %v1106_v13, %s1979_s13 }
0x1397   : > { %v1109_v14 = vpop.permute.xlu0 %1108 }
0x1398   : > { %1488 = vst.msk [vmem:[%s1362_s12 + $0xc] sm:$0x3] %vm343_vm1, %v1109_v14  ;;  %1629 = vmatmul.mubr.msk.f32.vlgmr.msra.gmra.mrb[6].mxu1 %vm357_vm2, %v1109_v14 }
0x146b   : > { %v1186_v16 = vpop.f32.mrb[6].mxu1 }
0x146c   : > { %v1190_v17 = vadd.f32 %v1490_v15, %v1186_v16  ;;  %v1630_v18 = vpop.f32.mrb[7].mxu1 }
0x146e   : > { %1813 = vtanh.f32 %v1190_v17  ;;  %v1492_v20 = vmul.f32 -1.442695, %v1190_v17 }
0x1470   : > { %1815 = vpow2.f32 %v1492_v20 }
0x1478   : > { %v1814_v19 = vpop.eup %1813 }
0x1479   : > { %1200 = vrot.lane.b32.xlu1 %v1814_v19, %s1978_s5 }
0x147a   : > { %v1816_v21 = vpop.eup %1815 }
0x147b   : > { %v1194_v22 = vadd.f32 1.0, %v1816_v21 }
0x147d   : > { %1817 = vrcp.f32 %v1194_v22 }
0x1487   : > { %v1818_v23 = vpop.eup %1817 }
0x1488   : > { %v1198_v26 = vmul.f32 %v1818_v23, %v1100_v10 }
0x14eb   : > { %v1201_v24 = vpop.permute.xlu1 %1200 }
0x14ec   : > { %v1203_v25 = vmul.f32 %v1818_v23, %v1201_v24 }
0x14ee   : > { %1205 = vrot.lane.b32.xlu0 %v1203_v25, %s1979_s13 }
0x1560   : > { %v1206_v27 = vpop.permute.xlu0 %1205 }
0x1561   : > { %v1208_v28 = vadd.f32 %v1206_v27, %v1198_v26 }
0x1563   : > { %1819 = vtanh.f32 %v1208_v28 }
0x156d   : > { %v1820_v29 = vpop.eup %1819 }
0x156e   : > { %1211 = vrot.lane.b32.xlu1 %v1820_v29, %s1978_s5  ;;  %s1370_s5 = scalar_lea.vmem %s2231_s26, %s1489_s21 [#allocation9]  ;;  %s1887_s26 = scalar_lea.vmem %s1886_s14, 512 }
0x156f   : > { %p1889_p12 = scmp.lt.s32.totalorder %s1887_s26, %s1881_s9 }
0x1571   : > { %p1890_p9 = por %p1889_p12, %p1888_p10 }
0x1572   : > { %1223 = vrot.lane.b32.xlu1 %v1208_v28, %s1980_s24 }
0x1573   : > { %p1891_p1 = pnand %p1890_p9, %p1884_p7 }
0x15e0   : > { %v1212_v30 = vpop.permute.xlu1 %1211 }
0x15e1   : > { %v1214_v31 = vmul.f32 %v1818_v23, %v1212_v30 }
0x15e3   : > { %1216 = vrot.lane.b32.xlu0 %v1214_v31, %s1979_s13 }
0x15e4   : > { %v1224_v32 = vpop.permute.xlu1 %1223 }
0x15e5   : > { %1226 = vst.msk [vmem:[#allocation3] sm:$0x3] %vm343_vm1, %v1224_v32 }
0x1655   : > { %v1217_v33 = vpop.permute.xlu0 %1216 }
0x1656   : > { %1494 = vst.msk [vmem:[%s1370_s5 + $0xe] sm:$0x3] %vm343_vm1, %v1217_v33  ;;  %1221 = vst.msk [vmem:[#allocation2] sm:$0x3] %vm343_vm1, %v1217_v33 }
0x1657   : > { %1894 = shalt.err (!%p1891_p1)
}
0x1658   : > { %s1895_s12 = scalar_lea.hbm %s2343_s10, 256  ;;  %s1899_s24 = scalar_lea.hbm %s2400_s4, 512 }
0x1659   : > { %p1896_p6 = scmp.ne.s32.totalorder %s2343_s10, %s1895_s12  ;;  %p1900_p4 = scmp.lt.u32.totalorder %s2343_s10, %s2400_s4 }
0x165a   : > { %p1901_p8 = scmp.lt.u32.totalorder %s1899_s24, %s1895_s12  ;;  %p1903_p3 = scmp.lt.u32.totalorder %s1895_s12, %s2343_s10 }
0x165b   : > { %p1897_p2 = pnand %p1896_p6, %p2411_p11 }
0x165c   : > { %p1902_p0 = por %p1901_p8, %p1900_p4 }
0x165d   : > { %p1898_p5 = pneg %p1897_p2 }
0x165e   : > { %p1904_p13 = por %p1903_p3, %p1902_p0 }
0x1660   : > { %p1905_p7 = pnand %p1904_p13, %p1898_p5 }
0x1662   : > { %1908 = shalt.err (!%p1905_p7)
}
0x1663   : > { %s1982_s27 = smov 2  }
0x1664   : > { %1683 = dma.vmem_to_hbm [thread:$0]  (%p2411_p11), %s2335_s8, 256, %s2343_s10, %s1228_s7, %s1979_s13, %s1979_s13, %s1982_s27  }
0x1665 PF: > { %s1262_s11 = sand.u32 1, %s1947_s15   ;;  %p2412_p10 = scmp.ne.s32.totalorder %s2406_s30, 0 }
0x1666   : > { %p2413_p12 = scmp.ge.s32.totalorder %s1967_s20, 2  ;;  %s1263_s9 = scalar_lea.sflag [#allocation6], %s1262_s11 }
0x1668   : > { %p1693_p9 = pnand %p2413_p12, %p2412_p10 }
0x166a   : > { %1942 = dma.done.wait (!%p1693_p9), %s1263_s9, 256  }
0x166b   : > { %1944 = vsyncadd (!%p1693_p9), %s1263_s9, 4294967040  ;;  %s23_s20 = sadd.s32 1, %s1967_s20   ;;  %s2414_s15 = smov %s1951_s16 }
0x166c   : > { %p20_p1 = scmp.ge.s32.totalorder %s23_s20, 4   ;;  %s2415_s16 = smov %s1955_s17 }
0x166d   : > { %s2416_s17 = smov %s2064_s29  ;;  %s2417_s18 = smov %s1963_s19 }
0x166e   : > { %s2418_s19 = smov %s2420_s23  ;;  %22 = sbr.rel (!%p20_p1) target bundleno = 8 (0x8), region = 120 }
0x1675   :  { %1268 = vsyncpa [#allocation5], 1 }
0x1676   :  { %1270 = vsyncpa [#allocation5 + $0x1], 1 }
0x1677   :  { %1271 = vsyncpa [#allocation8], 1 }
0x1678   :  { %1273 = vsyncpa [#allocation8 + $0x1], 1 }
0x1679   :  { %1274 = vsyncpa [#allocation6], 1 }
0x167a   :  { %1276 = vsyncpa [#allocation6 + $0x1], 1 }

</bundles_post_ra>
